<compile_context>
chip_gen: v6e
topology: v6e:2x2x1
jax: 0.10.0
libtpu: 0.0.40
codegen_flags: <defaults>
</compile_context>

<pallas_src>
import jax
import jax.numpy as jnp
from jax.experimental import pallas as pl
from jax.experimental.pallas import tpu as pltpu


def _round_up(x, m):
    return (x + m - 1) // m * m


def _make_kernel(BB, Cp, Op, Kdim, kh, kw, dilation, Wp, Npad):
    def kernel(x_ref, w_ref, b_ref, o_ref, patch_ref):
        # x_ref:     (BB, Cp, Lpad)   bf16  flattened padded inputs of this (b-block, d)
        # w_ref:     (Op, Kdim)       bf16  sampled weights of depth group d (resident over b)
        # b_ref:     (Op, 1)          f32   sampled bias of depth group d
        # o_ref:     (BB, Op, Npad)         lane-dense output slab
        # patch_ref: (Kdim, BB*Npad)  bf16  VMEM im2col scratch
        #
        # Build the patch buffer: every row/column is overwritten each grid
        # step, so uninitialized scratch never leaks into the matmul.
        for bb in range(BB):
            for i in range(kh):
                for j in range(kw):
                    off = i * dilation * Wp + j * dilation
                    k0 = (i * kw + j) * Cp
                    patch_ref[k0:k0 + Cp, bb * Npad:(bb + 1) * Npad] = (
                        x_ref[bb, :, off:off + Npad])
        # One fused MXU matmul over K = kh*kw*Cp, accumulated in f32.
        acc = jnp.dot(w_ref[...], patch_ref[...],
                      preferred_element_type=jnp.float32)
        # Bias epilogue + single lane-dense store per batch element
        # (Npad is a multiple of 128, so slices/stores are lane-aligned).
        for bb in range(BB):
            o_ref[bb] = (acc[:, bb * Npad:(bb + 1) * Npad]
                         + b_ref[...]).astype(o_ref.dtype)

    return kernel


def bayes_gaussian_conv2_5d(x, weight_mu, weight_rho, bias_mu, bias_rho, key,
                            *, stride=1, padding=0, dilation=1):
    """Forward pass. Returns (output, sampled_weight, sampled_bias)."""
    B, C, D, H, W = x.shape
    O, Cin, kh, kw = weight_mu.shape
    assert Cin == C
    # TODO(synk): stride > 1 breaks the flat shifted-window trick; only stride=1
    # (the module default) is implemented in the Pallas fast path.
    assert stride == 1, "Pallas path implements stride == 1 only"

    # ---- Gaussian reparameterized sampling (glue, plain JAX) ---------------
    k_w, k_b = jax.random.split(key)
    w_std = jnp.log1p(jnp.exp(weight_rho))
    stacked_mu = jnp.tile(weight_mu, (D, 1, 1, 1))            # (D*O, C, kh, kw)
    stacked_std = jnp.tile(w_std, (D, 1, 1, 1))
    eps_w = jax.random.normal(k_w, stacked_mu.shape, dtype=stacked_mu.dtype)
    final_w = stacked_mu + eps_w * stacked_std                # (D*O, C, kh, kw)

    b_std = jnp.log1p(jnp.exp(bias_rho))
    stacked_bmu = jnp.tile(bias_mu, (D,))                     # (D*O,)
    stacked_bstd = jnp.tile(b_std, (D,))
    eps_b = jax.random.normal(k_b, stacked_bmu.shape, dtype=stacked_bmu.dtype)
    final_b = stacked_bmu + eps_b * stacked_bstd              # (D*O,)

    # ---- geometry -----------------------------------------------------------
    Hp, Wp = H + 2 * padding, W + 2 * padding
    Hout = (Hp - dilation * (kh - 1) - 1) // stride + 1
    Wout = (Wp - dilation * (kw - 1) - 1) // stride + 1
    HWfull = Hout * Wp                                        # full-width rows
    Npad = _round_up(HWfull, 128)                             # lane-dense output width
    L = Hp * Wp
    max_off = dilation * (kh - 1) * Wp + dilation * (kw - 1)
    Lpad = _round_up(max(L, max_off + Npad), 128)             # lane-align flat axis
    Cp = _round_up(C, 8)                                      # sublane-align K blocks
    Op = _round_up(O, 8)                                      # sublane-align M
    Kdim = kh * kw * Cp

    out_itemsize = jnp.dtype(x.dtype).itemsize

    # ---- choose batch block BB (amortize ~0.35us/step) under a VMEM budget --
    def vmem_bytes(bb):
        x_blk = bb * Cp * Lpad * 2
        o_blk = bb * Op * Npad * out_itemsize
        w_blk = Op * Kdim * 2
        b_blk = Op * 4
        patch = Kdim * bb * Npad * 2
        return 2 * (x_blk + o_blk + w_blk + b_blk) + patch    # x2 = double buffering

    budget = 24 * 1024 * 1024
    BB = 1
    for cand in range(B, 0, -1):
        if B % cand == 0 and vmem_bytes(cand) <= budget:
            BB = cand
            break

    # ---- layout prep (cheap, input-sized; bf16 first to halve prep traffic) -
    xg = jnp.transpose(x.astype(jnp.bfloat16), (0, 2, 1, 3, 4))   # (B, D, C, H, W)
    xp = jnp.pad(xg, ((0, 0), (0, 0), (0, Cp - C),
                      (padding, padding), (padding, padding)))    # channel + spatial pad
    x_flat = xp.reshape(B, D, Cp, L)
    x_flat = jnp.pad(x_flat, ((0, 0), (0, 0), (0, 0), (0, Lpad - L)))

    # Per-depth-group weights: w_g[d, o, (i*kw+j)*Cp + c] = final_w[d*O + o, c, i, j]
    w5 = final_w.reshape(D, O, C, kh, kw)
    w5 = jnp.pad(w5, ((0, 0), (0, Op - O), (0, Cp - C), (0, 0), (0, 0)))
    w_g = (jnp.transpose(w5, (0, 1, 3, 4, 2))
           .reshape(D, Op, Kdim)
           .astype(jnp.bfloat16))
    b2 = jnp.pad(final_b.reshape(D, O), ((0, 0), (0, Op - O)))
    b_g = b2.reshape(D, Op, 1).astype(jnp.float32)

    kernel = _make_kernel(BB, Cp, Op, Kdim, kh, kw, dilation, Wp, Npad)

    # Explicit VMEM limit with headroom (v7x has only 64 MiB physical).
    vmem_limit = int(min(max(2 * vmem_bytes(BB), 32 << 20), 48 << 20))
    # TODO(synk): on v5e, pipeline_mode=pl.Buffered(3) on the x BlockSpec can
    # further hide the dominant x DMA; kept at the default depth here.

    out_slab = pl.pallas_call(
        kernel,
        out_shape=jax.ShapeDtypeStruct((B, D, Op, Npad), x.dtype),
        grid=(D, B // BB),  # d slow -> weight/bias blocks stay resident across b
        in_specs=[
            pl.BlockSpec((BB, None, Cp, Lpad), lambda d, b: (b, d, 0, 0)),
            pl.BlockSpec((None, Op, Kdim), lambda d, b: (d, 0, 0)),
            pl.BlockSpec((None, Op, 1), lambda d, b: (d, 0, 0)),
        ],
        out_specs=pl.BlockSpec((BB, None, Op, Npad), lambda d, b: (b, d, 0, 0)),
        scratch_shapes=[pltpu.VMEM((Kdim, BB * Npad), jnp.bfloat16)],
        compiler_params=pltpu.CompilerParams(
            dimension_semantics=("parallel", "parallel"),
            vmem_limit_bytes=vmem_limit),
    )(x_flat, w_g, b_g)

    # Crop (Op->O, Npad->HWfull, Wp->Wout) + final permute: cheap XLA ops.
    out = out_slab[:, :, :O, :HWfull].reshape(B, D, O, Hout, Wp)[..., :Wout]
    out = jnp.transpose(out, (0, 2, 1, 3, 4)).astype(x.dtype)
    return out, final_w, final_b


if __name__ == "__main__":
    key = jax.random.PRNGKey(0)
    kx, kwm, kwr, kbm, kbr, keps = jax.random.split(key, 6)

    # Small shapes consistent with the module's forward.
    B, C, D, H, W = 2, 4, 3, 16, 16
    O, kh, kw = 8, 3, 3
    stride, padding, dilation = 1, 1, 1

    # Deterministic "reset_parameters": mu ~ N(0, 0.01), rho ~ N(-4, 0.01).
    weight_mu = 0.0 + 0.01 * jax.random.normal(kwm, (O, C, kh, kw), jnp.float32)
    weight_rho = -4.0 + 0.01 * jax.random.normal(kwr, (O, C, kh, kw), jnp.float32)
    bias_mu = 0.0 + 0.01 * jax.random.normal(kbm, (O,), jnp.float32)
    bias_rho = -4.0 + 0.01 * jax.random.normal(kbr, (O,), jnp.float32)
    x = jax.random.normal(kx, (B, C, D, H, W), jnp.float32)

    out, final_w, final_b = bayes_gaussian_conv2_5d(
        x, weight_mu, weight_rho, bias_mu, bias_rho, keps,
        stride=stride, padding=padding, dilation=dilation)
    out = jax.block_until_ready(out)

    # Pure-JAX reference mirroring the torch forward (same sampled weights).
    x2d = jnp.transpose(x, (0, 2, 1, 3, 4)).reshape(B, D * C, H, W)
    ref = jax.lax.conv_general_dilated(
        x2d, final_w, window_strides=(stride, stride),
        padding=((padding, padding), (padding, padding)),
        rhs_dilation=(dilation, dilation),
        feature_group_count=D,
        dimension_numbers=("NCHW", "OIHW", "NCHW"))
    ref = ref + final_b[None, :, None, None]
    Hout, Wout = ref.shape[-2], ref.shape[-1]
    ref = ref.reshape(B, D, O, Hout, Wout).transpose(0, 2, 1, 3, 4)

    assert out.shape == ref.shape == (B, O, D, Hout, Wout), (out.shape, ref.shape)
    err = float(jnp.max(jnp.abs(out - ref)))
    # bf16 inputs/weights with f32 accumulation: deliberate precision change
    # vs. the fp32 torch module; tolerance verified for this configuration.
    assert jnp.allclose(out, ref, rtol=2e-2, atol=5e-3), err
    print("KERNEL_OK")
</pallas_src>

<mosaic_0001>
module attributes {stable_mosaic.version = 11 : i64} {
  func.func @kernel(%arg0: i32, %arg1: i32, %arg2: memref<2x1x8x512xbf16, #tpu.memory_space<vmem>>, %arg3: memref<1x8x72xbf16, #tpu.memory_space<vmem>>, %arg4: memref<1x8x1xf32, #tpu.memory_space<vmem>>, %arg5: memref<2x1x8x384xf32, #tpu.memory_space<vmem>>, %arg6: memref<72x768xbf16, #tpu.memory_space<vmem>>) attributes {dimension_semantics = [#tpu.dimension_semantics<parallel>, #tpu.dimension_semantics<parallel>], iteration_bounds = array<i64: 3, 1>, scalar_prefetch = 0 : i64, scratch_operands = 1 : i64, tpu.core_type = #tpu.core_type<tc>, window_params = [{transform_indices = @transform_0, window_bounds = array<i64: 2, 1, 8, 512>}, {transform_indices = @transform_1, window_bounds = array<i64: 1, 8, 72>}, {transform_indices = @transform_2, window_bounds = array<i64: 1, 8, 1>}, {transform_indices = @transform_3, window_bounds = array<i64: 2, 1, 8, 384>}]} {
    %c0 = arith.constant 0 : index
    %c0_0 = arith.constant 0 : index
    %c0_1 = arith.constant 0 : index
    %c0_2 = arith.constant 0 : index
    %0 = vector.load %arg2[%c0, %c0_0, %c0_1, %c0_2] : memref<2x1x8x512xbf16, #tpu.memory_space<vmem>>, vector<1x1x8x384xbf16>
    %1 = vector.shape_cast %0 : vector<1x1x8x384xbf16> to vector<8x384xbf16>
    %c0_3 = arith.constant 0 : index
    %c0_4 = arith.constant 0 : index
    %2 = vector.load %arg6[%c0_3, %c0_4] : memref<72x768xbf16, #tpu.memory_space<vmem>>, vector<8x384xbf16>
    tpu.vector_store %arg6[%c0_3, %c0_4], %1 {strides = array<i32>} : memref<72x768xbf16, #tpu.memory_space<vmem>>, vector<8x384xbf16>,
    %c0_5 = arith.constant 0 : index
    %c0_6 = arith.constant 0 : index
    %c0_7 = arith.constant 0 : index
    %c1 = arith.constant 1 : index
    %3 = vector.load %arg2[%c0_5, %c0_6, %c0_7, %c1] : memref<2x1x8x512xbf16, #tpu.memory_space<vmem>>, vector<1x1x8x384xbf16>
    %4 = vector.shape_cast %3 : vector<1x1x8x384xbf16> to vector<8x384xbf16>
    %c8 = arith.constant 8 : index
    %c0_8 = arith.constant 0 : index
    %5 = vector.load %arg6[%c8, %c0_8] : memref<72x768xbf16, #tpu.memory_space<vmem>>, vector<8x384xbf16>
    tpu.vector_store %arg6[%c8, %c0_8], %4 {strides = array<i32>} : memref<72x768xbf16, #tpu.memory_space<vmem>>, vector<8x384xbf16>,
    %c0_9 = arith.constant 0 : index
    %c0_10 = arith.constant 0 : index
    %c0_11 = arith.constant 0 : index
    %c2 = arith.constant 2 : index
    %6 = vector.load %arg2[%c0_9, %c0_10, %c0_11, %c2] : memref<2x1x8x512xbf16, #tpu.memory_space<vmem>>, vector<1x1x8x384xbf16>
    %7 = vector.shape_cast %6 : vector<1x1x8x384xbf16> to vector<8x384xbf16>
    %c16 = arith.constant 16 : index
    %c0_12 = arith.constant 0 : index
    %8 = vector.load %arg6[%c16, %c0_12] : memref<72x768xbf16, #tpu.memory_space<vmem>>, vector<8x384xbf16>
    tpu.vector_store %arg6[%c16, %c0_12], %7 {strides = array<i32>} : memref<72x768xbf16, #tpu.memory_space<vmem>>, vector<8x384xbf16>,
    %c0_13 = arith.constant 0 : index
    %c0_14 = arith.constant 0 : index
    %c0_15 = arith.constant 0 : index
    %c18 = arith.constant 18 : index
    %9 = vector.load %arg2[%c0_13, %c0_14, %c0_15, %c18] : memref<2x1x8x512xbf16, #tpu.memory_space<vmem>>, vector<1x1x8x384xbf16>
    %10 = vector.shape_cast %9 : vector<1x1x8x384xbf16> to vector<8x384xbf16>
    %c24 = arith.constant 24 : index
    %c0_16 = arith.constant 0 : index
    %11 = vector.load %arg6[%c24, %c0_16] : memref<72x768xbf16, #tpu.memory_space<vmem>>, vector<8x384xbf16>
    tpu.vector_store %arg6[%c24, %c0_16], %10 {strides = array<i32>} : memref<72x768xbf16, #tpu.memory_space<vmem>>, vector<8x384xbf16>,
    %c0_17 = arith.constant 0 : index
    %c0_18 = arith.constant 0 : index
    %c0_19 = arith.constant 0 : index
    %c19 = arith.constant 19 : index
    %12 = vector.load %arg2[%c0_17, %c0_18, %c0_19, %c19] : memref<2x1x8x512xbf16, #tpu.memory_space<vmem>>, vector<1x1x8x384xbf16>
    %13 = vector.shape_cast %12 : vector<1x1x8x384xbf16> to vector<8x384xbf16>
    %c32 = arith.constant 32 : index
    %c0_20 = arith.constant 0 : index
    %14 = vector.load %arg6[%c32, %c0_20] : memref<72x768xbf16, #tpu.memory_space<vmem>>, vector<8x384xbf16>
    tpu.vector_store %arg6[%c32, %c0_20], %13 {strides = array<i32>} : memref<72x768xbf16, #tpu.memory_space<vmem>>, vector<8x384xbf16>,
    %c0_21 = arith.constant 0 : index
    %c0_22 = arith.constant 0 : index
    %c0_23 = arith.constant 0 : index
    %c20 = arith.constant 20 : index
    %15 = vector.load %arg2[%c0_21, %c0_22, %c0_23, %c20] : memref<2x1x8x512xbf16, #tpu.memory_space<vmem>>, vector<1x1x8x384xbf16>
    %16 = vector.shape_cast %15 : vector<1x1x8x384xbf16> to vector<8x384xbf16>
    %c40 = arith.constant 40 : index
    %c0_24 = arith.constant 0 : index
    %17 = vector.load %arg6[%c40, %c0_24] : memref<72x768xbf16, #tpu.memory_space<vmem>>, vector<8x384xbf16>
    tpu.vector_store %arg6[%c40, %c0_24], %16 {strides = array<i32>} : memref<72x768xbf16, #tpu.memory_space<vmem>>, vector<8x384xbf16>,
    %c0_25 = arith.constant 0 : index
    %c0_26 = arith.constant 0 : index
    %c0_27 = arith.constant 0 : index
    %c36 = arith.constant 36 : index
    %18 = vector.load %arg2[%c0_25, %c0_26, %c0_27, %c36] : memref<2x1x8x512xbf16, #tpu.memory_space<vmem>>, vector<1x1x8x384xbf16>
    %19 = vector.shape_cast %18 : vector<1x1x8x384xbf16> to vector<8x384xbf16>
    %c48 = arith.constant 48 : index
    %c0_28 = arith.constant 0 : index
    %20 = vector.load %arg6[%c48, %c0_28] : memref<72x768xbf16, #tpu.memory_space<vmem>>, vector<8x384xbf16>
    tpu.vector_store %arg6[%c48, %c0_28], %19 {strides = array<i32>} : memref<72x768xbf16, #tpu.memory_space<vmem>>, vector<8x384xbf16>,
    %c0_29 = arith.constant 0 : index
    %c0_30 = arith.constant 0 : index
    %c0_31 = arith.constant 0 : index
    %c37 = arith.constant 37 : index
    %21 = vector.load %arg2[%c0_29, %c0_30, %c0_31, %c37] : memref<2x1x8x512xbf16, #tpu.memory_space<vmem>>, vector<1x1x8x384xbf16>
    %22 = vector.shape_cast %21 : vector<1x1x8x384xbf16> to vector<8x384xbf16>
    %c56 = arith.constant 56 : index
    %c0_32 = arith.constant 0 : index
    %23 = vector.load %arg6[%c56, %c0_32] : memref<72x768xbf16, #tpu.memory_space<vmem>>, vector<8x384xbf16>
    tpu.vector_store %arg6[%c56, %c0_32], %22 {strides = array<i32>} : memref<72x768xbf16, #tpu.memory_space<vmem>>, vector<8x384xbf16>,
    %c0_33 = arith.constant 0 : index
    %c0_34 = arith.constant 0 : index
    %c0_35 = arith.constant 0 : index
    %c38 = arith.constant 38 : index
    %24 = vector.load %arg2[%c0_33, %c0_34, %c0_35, %c38] : memref<2x1x8x512xbf16, #tpu.memory_space<vmem>>, vector<1x1x8x384xbf16>
    %25 = vector.shape_cast %24 : vector<1x1x8x384xbf16> to vector<8x384xbf16>
    %c64 = arith.constant 64 : index
    %c0_36 = arith.constant 0 : index
    %26 = vector.load %arg6[%c64, %c0_36] : memref<72x768xbf16, #tpu.memory_space<vmem>>, vector<8x384xbf16>
    tpu.vector_store %arg6[%c64, %c0_36], %25 {strides = array<i32>} : memref<72x768xbf16, #tpu.memory_space<vmem>>, vector<8x384xbf16>,
    %c1_37 = arith.constant 1 : index
    %c0_38 = arith.constant 0 : index
    %c0_39 = arith.constant 0 : index
    %c0_40 = arith.constant 0 : index
    %27 = vector.load %arg2[%c1_37, %c0_38, %c0_39, %c0_40] : memref<2x1x8x512xbf16, #tpu.memory_space<vmem>>, vector<1x1x8x384xbf16>
    %28 = vector.shape_cast %27 : vector<1x1x8x384xbf16> to vector<8x384xbf16>
    %c0_41 = arith.constant 0 : index
    %c384 = arith.constant 384 : index
    %29 = vector.load %arg6[%c0_41, %c384] : memref<72x768xbf16, #tpu.memory_space<vmem>>, vector<8x384xbf16>
    tpu.vector_store %arg6[%c0_41, %c384], %28 {strides = array<i32>} : memref<72x768xbf16, #tpu.memory_space<vmem>>, vector<8x384xbf16>,
    %c1_42 = arith.constant 1 : index
    %c0_43 = arith.constant 0 : index
    %c0_44 = arith.constant 0 : index
    %c1_45 = arith.constant 1 : index
    %30 = vector.load %arg2[%c1_42, %c0_43, %c0_44, %c1_45] : memref<2x1x8x512xbf16, #tpu.memory_space<vmem>>, vector<1x1x8x384xbf16>
    %31 = vector.shape_cast %30 : vector<1x1x8x384xbf16> to vector<8x384xbf16>
    %c8_46 = arith.constant 8 : index
    %c384_47 = arith.constant 384 : index
    %32 = vector.load %arg6[%c8_46, %c384_47] : memref<72x768xbf16, #tpu.memory_space<vmem>>, vector<8x384xbf16>
    tpu.vector_store %arg6[%c8_46, %c384_47], %31 {strides = array<i32>} : memref<72x768xbf16, #tpu.memory_space<vmem>>, vector<8x384xbf16>,
    %c1_48 = arith.constant 1 : index
    %c0_49 = arith.constant 0 : index
    %c0_50 = arith.constant 0 : index
    %c2_51 = arith.constant 2 : index
    %33 = vector.load %arg2[%c1_48, %c0_49, %c0_50, %c2_51] : memref<2x1x8x512xbf16, #tpu.memory_space<vmem>>, vector<1x1x8x384xbf16>
    %34 = vector.shape_cast %33 : vector<1x1x8x384xbf16> to vector<8x384xbf16>
    %c16_52 = arith.constant 16 : index
    %c384_53 = arith.constant 384 : index
    %35 = vector.load %arg6[%c16_52, %c384_53] : memref<72x768xbf16, #tpu.memory_space<vmem>>, vector<8x384xbf16>
    tpu.vector_store %arg6[%c16_52, %c384_53], %34 {strides = array<i32>} : memref<72x768xbf16, #tpu.memory_space<vmem>>, vector<8x384xbf16>,
    %c1_54 = arith.constant 1 : index
    %c0_55 = arith.constant 0 : index
    %c0_56 = arith.constant 0 : index
    %c18_57 = arith.constant 18 : index
    %36 = vector.load %arg2[%c1_54, %c0_55, %c0_56, %c18_57] : memref<2x1x8x512xbf16, #tpu.memory_space<vmem>>, vector<1x1x8x384xbf16>
    %37 = vector.shape_cast %36 : vector<1x1x8x384xbf16> to vector<8x384xbf16>
    %c24_58 = arith.constant 24 : index
    %c384_59 = arith.constant 384 : index
    %38 = vector.load %arg6[%c24_58, %c384_59] : memref<72x768xbf16, #tpu.memory_space<vmem>>, vector<8x384xbf16>
    tpu.vector_store %arg6[%c24_58, %c384_59], %37 {strides = array<i32>} : memref<72x768xbf16, #tpu.memory_space<vmem>>, vector<8x384xbf16>,
    %c1_60 = arith.constant 1 : index
    %c0_61 = arith.constant 0 : index
    %c0_62 = arith.constant 0 : index
    %c19_63 = arith.constant 19 : index
    %39 = vector.load %arg2[%c1_60, %c0_61, %c0_62, %c19_63] : memref<2x1x8x512xbf16, #tpu.memory_space<vmem>>, vector<1x1x8x384xbf16>
    %40 = vector.shape_cast %39 : vector<1x1x8x384xbf16> to vector<8x384xbf16>
    %c32_64 = arith.constant 32 : index
    %c384_65 = arith.constant 384 : index
    %41 = vector.load %arg6[%c32_64, %c384_65] : memref<72x768xbf16, #tpu.memory_space<vmem>>, vector<8x384xbf16>
    tpu.vector_store %arg6[%c32_64, %c384_65], %40 {strides = array<i32>} : memref<72x768xbf16, #tpu.memory_space<vmem>>, vector<8x384xbf16>,
    %c1_66 = arith.constant 1 : index
    %c0_67 = arith.constant 0 : index
    %c0_68 = arith.constant 0 : index
    %c20_69 = arith.constant 20 : index
    %42 = vector.load %arg2[%c1_66, %c0_67, %c0_68, %c20_69] : memref<2x1x8x512xbf16, #tpu.memory_space<vmem>>, vector<1x1x8x384xbf16>
    %43 = vector.shape_cast %42 : vector<1x1x8x384xbf16> to vector<8x384xbf16>
    %c40_70 = arith.constant 40 : index
    %c384_71 = arith.constant 384 : index
    %44 = vector.load %arg6[%c40_70, %c384_71] : memref<72x768xbf16, #tpu.memory_space<vmem>>, vector<8x384xbf16>
    tpu.vector_store %arg6[%c40_70, %c384_71], %43 {strides = array<i32>} : memref<72x768xbf16, #tpu.memory_space<vmem>>, vector<8x384xbf16>,
    %c1_72 = arith.constant 1 : index
    %c0_73 = arith.constant 0 : index
    %c0_74 = arith.constant 0 : index
    %c36_75 = arith.constant 36 : index
    %45 = vector.load %arg2[%c1_72, %c0_73, %c0_74, %c36_75] : memref<2x1x8x512xbf16, #tpu.memory_space<vmem>>, vector<1x1x8x384xbf16>
    %46 = vector.shape_cast %45 : vector<1x1x8x384xbf16> to vector<8x384xbf16>
    %c48_76 = arith.constant 48 : index
    %c384_77 = arith.constant 384 : index
    %47 = vector.load %arg6[%c48_76, %c384_77] : memref<72x768xbf16, #tpu.memory_space<vmem>>, vector<8x384xbf16>
    tpu.vector_store %arg6[%c48_76, %c384_77], %46 {strides = array<i32>} : memref<72x768xbf16, #tpu.memory_space<vmem>>, vector<8x384xbf16>,
    %c1_78 = arith.constant 1 : index
    %c0_79 = arith.constant 0 : index
    %c0_80 = arith.constant 0 : index
    %c37_81 = arith.constant 37 : index
    %48 = vector.load %arg2[%c1_78, %c0_79, %c0_80, %c37_81] : memref<2x1x8x512xbf16, #tpu.memory_space<vmem>>, vector<1x1x8x384xbf16>
    %49 = vector.shape_cast %48 : vector<1x1x8x384xbf16> to vector<8x384xbf16>
    %c56_82 = arith.constant 56 : index
    %c384_83 = arith.constant 384 : index
    %50 = vector.load %arg6[%c56_82, %c384_83] : memref<72x768xbf16, #tpu.memory_space<vmem>>, vector<8x384xbf16>
    tpu.vector_store %arg6[%c56_82, %c384_83], %49 {strides = array<i32>} : memref<72x768xbf16, #tpu.memory_space<vmem>>, vector<8x384xbf16>,
    %c1_84 = arith.constant 1 : index
    %c0_85 = arith.constant 0 : index
    %c0_86 = arith.constant 0 : index
    %c38_87 = arith.constant 38 : index
    %51 = vector.load %arg2[%c1_84, %c0_85, %c0_86, %c38_87] : memref<2x1x8x512xbf16, #tpu.memory_space<vmem>>, vector<1x1x8x384xbf16>
    %52 = vector.shape_cast %51 : vector<1x1x8x384xbf16> to vector<8x384xbf16>
    %c64_88 = arith.constant 64 : index
    %c384_89 = arith.constant 384 : index
    %53 = vector.load %arg6[%c64_88, %c384_89] : memref<72x768xbf16, #tpu.memory_space<vmem>>, vector<8x384xbf16>
    tpu.vector_store %arg6[%c64_88, %c384_89], %52 {strides = array<i32>} : memref<72x768xbf16, #tpu.memory_space<vmem>>, vector<8x384xbf16>,
    %c0_90 = arith.constant 0 : index
    %c0_91 = arith.constant 0 : index
    %c0_92 = arith.constant 0 : index
    %54 = vector.load %arg3[%c0_90, %c0_91, %c0_92] : memref<1x8x72xbf16, #tpu.memory_space<vmem>>, vector<1x8x72xbf16>
    %55 = vector.shape_cast %54 : vector<1x8x72xbf16> to vector<8x72xbf16>
    %c0_93 = arith.constant 0 : index
    %c0_94 = arith.constant 0 : index
    %56 = vector.load %arg6[%c0_93, %c0_94] : memref<72x768xbf16, #tpu.memory_space<vmem>>, vector<72x768xbf16>
    %cst = arith.constant dense<0.000000e+00> : vector<8x768xf32>
    %57 = tpu.matmul %55, %56, %cst {dimension_numbers = #tpu.dot_dimension_numbers<[1], [0], [0], [1], [0, 0, 1, 1], [], []>} : vector<8x72xbf16>, vector<72x768xbf16>, vector<8x768xf32> -> vector<8x768xf32>
    %58 = vector.extract_strided_slice %57 {offsets = [0, 0], sizes = [8, 384], strides = [1, 1]} : vector<8x768xf32> to vector<8x384xf32>
    %c0_95 = arith.constant 0 : index
    %c0_96 = arith.constant 0 : index
    %c0_97 = arith.constant 0 : index
    %59 = vector.load %arg4[%c0_95, %c0_96, %c0_97] : memref<1x8x1xf32, #tpu.memory_space<vmem>>, vector<1x8x1xf32>
    %60 = vector.shape_cast %59 : vector<1x8x1xf32> to vector<8x1xf32>
    %61 = vector.broadcast %60 : vector<8x1xf32> to vector<8x384xf32>
    %62 = arith.addf %58, %61 : vector<8x384xf32>
    %c0_98 = arith.constant 0 : index
    %c0_99 = arith.constant 0 : index
    %c0_100 = arith.constant 0 : index
    %c0_101 = arith.constant 0 : index
    %63 = vector.load %arg5[%c0_98, %c0_99, %c0_100, %c0_101] : memref<2x1x8x384xf32, #tpu.memory_space<vmem>>, vector<1x1x8x384xf32>
    %64 = vector.shape_cast %63 : vector<1x1x8x384xf32> to vector<8x384xf32>
    %65 = vector.shape_cast %62 : vector<8x384xf32> to vector<1x1x8x384xf32>
    tpu.vector_store %arg5[%c0_98, %c0_99, %c0_100, %c0_101], %65 {strides = array<i32>} : memref<2x1x8x384xf32, #tpu.memory_space<vmem>>, vector<1x1x8x384xf32>,
    %66 = vector.extract_strided_slice %57 {offsets = [0, 384], sizes = [8, 384], strides = [1, 1]} : vector<8x768xf32> to vector<8x384xf32>
    %c0_102 = arith.constant 0 : index
    %c0_103 = arith.constant 0 : index
    %c0_104 = arith.constant 0 : index
    %67 = vector.load %arg4[%c0_102, %c0_103, %c0_104] : memref<1x8x1xf32, #tpu.memory_space<vmem>>, vector<1x8x1xf32>
    %68 = vector.shape_cast %67 : vector<1x8x1xf32> to vector<8x1xf32>
    %69 = vector.broadcast %68 : vector<8x1xf32> to vector<8x384xf32>
    %70 = arith.addf %66, %69 : vector<8x384xf32>
    %c1_105 = arith.constant 1 : index
    %c0_106 = arith.constant 0 : index
    %c0_107 = arith.constant 0 : index
    %c0_108 = arith.constant 0 : index
    %71 = vector.load %arg5[%c1_105, %c0_106, %c0_107, %c0_108] : memref<2x1x8x384xf32, #tpu.memory_space<vmem>>, vector<1x1x8x384xf32>
    %72 = vector.shape_cast %71 : vector<1x1x8x384xf32> to vector<8x384xf32>
    %73 = vector.shape_cast %70 : vector<8x384xf32> to vector<1x1x8x384xf32>
    tpu.vector_store %arg5[%c1_105, %c0_106, %c0_107, %c0_108], %73 {strides = array<i32>} : memref<2x1x8x384xf32, #tpu.memory_space<vmem>>, vector<1x1x8x384xf32>,
    return
  }
  func.func @transform_0(%arg0: i32, %arg1: i32) -> (i32, i32, i32, i32) {
    %c0_i32 = arith.constant 0 : i32
    %c0_i32_0 = arith.constant 0 : i32
    %c0_i32_1 = arith.constant 0 : i32
    return %arg1, %arg0, %c0_i32, %c0_i32_0 : i32, i32, i32, i32
  }
  func.func @transform_1(%arg0: i32, %arg1: i32) -> (i32, i32, i32) {
    %c0_i32 = arith.constant 0 : i32
    %c0_i32_0 = arith.constant 0 : i32
    %c0_i32_1 = arith.constant 0 : i32
    return %arg0, %c0_i32, %c0_i32_0 : i32, i32, i32
  }
  func.func @transform_2(%arg0: i32, %arg1: i32) -> (i32, i32, i32) {
    %c0_i32 = arith.constant 0 : i32
    %c0_i32_0 = arith.constant 0 : i32
    %c0_i32_1 = arith.constant 0 : i32
    return %arg0, %c0_i32, %c0_i32_0 : i32, i32, i32
  }
  func.func @transform_3(%arg0: i32, %arg1: i32) -> (i32, i32, i32, i32) {
    %c0_i32 = arith.constant 0 : i32
    %c0_i32_0 = arith.constant 0 : i32
    %c0_i32_1 = arith.constant 0 : i32
    return %arg1, %arg0, %c0_i32, %c0_i32_0 : i32, i32, i32, i32
  }
}

</mosaic_0001>

<bundles_post_ra>
// kernel: tpu_custom_call.1
= control target key start
LH: loop header
LB: loop body
LE: loop exit
PB: predicated region body
PF: predicated region fallthrough
CT: control target
= control target key end

     0   :  { %8 = vsyncpa [#allocation4], 0  ;;  %s1571_s0 = inlined_call_operand.hbm [shape: bf16[2,3,8,512], index: 0, kind: input, shape index: {}]   ;;  %s1572_s1 = inlined_call_operand.vmem [shape: bf16[3,8,72], index: 1, kind: input, shape index: {}]   ;;  %s1573_s2 = inlined_call_operand.vmem [shape: f32[3,8,1], index: 2, kind: input, shape index: {}]   ;;  %s1574_s3 = inlined_call_operand.hbm [shape: f32[2,3,8,384], index: 3, kind: output, shape index: {}]  }
   0x1   :  { %10 = vsyncpa [#allocation4 + $0x1], 0 }
   0x2   :  { %11 = vsyncpa [#allocation5], 0 }
   0x3   :  { %13 = vsyncpa [#allocation5 + $0x1], 0  ;;  %s1325_s12 = smov 0   ;;  %s1327_s13 = smov 0  }
   0x4   :  { %s1329_s14 = smov 0   ;;  %s1331_s15 = smov 0  }
   0x5   :  { %s1333_s16 = smov 0   ;;  %s1335_s17 = smov 0  }
   0x6 LB: > { %s997_s18 = sadd.s32 4294967295, %s1286_s17   ;;  %s998_s19 = sadd.s32 4294967294, %s1286_s17   ;;  %s1286_s17 = sphi %s1335_s17, %s19_s17   ;;  %s1282_s16 = sphi %s1333_s16, %s1584_s16   ;;  %s1278_s15 = sphi %s1331_s15, %s1583_s15   ;;  %s1274_s14 = sphi %s1329_s14, %s1582_s14   ;;  %s1270_s13 = sphi %s1327_s13, %s1581_s13   ;;  %s1266_s12 = sphi %s1325_s12, %s1580_s12  }
   0x7   : > { %s31_s20 = sadd.s32 1, %s1282_s16  ;;  %s40_s21 = sadd.s32 1, %s1274_s14 }
   0x8   : > { %p33_p0 = scmp.ge.s32.totalorder %s31_s20, 3  ;;  %p47_p1 = scmp.ne.s32.totalorder %s1274_s14, %s1270_s13 }
   0x9   : > { %p48_p2 = scmp.eq.s32.totalorder %s1286_s17, 0  ;;  %p53_p3 = scmp.ne.s32.totalorder %s1270_s13, %s1266_s12 }
   0xa   : > { %s1586_s20 = smov (%p33_p0, %s31_s20), 0  ;;  %p54_p5 = scmp.eq.s32.totalorder %s997_s18, 0 }
   0xb   : > { %p1366_p4 = por %p48_p2, %p47_p1  ;;  %s36_s23 = ssub.s32 %s1282_s16, %s1586_s20 }
   0xc   : > { %p131_p6 = scmp.eq.s32.totalorder %s997_s18, 2  ;;  %p38_p7 = scmp.eq.s32.totalorder %s36_s23, 0 }
   0xd   : > { %p1372_p8 = por %p54_p5, %p53_p3  ;;  %p137_p10 = scmp.eq.s32.totalorder %s998_s19, 2 }
   0xe   : > { %p1376_p9 = por %p131_p6, %p47_p1  ;;  %p1083_p12 = scmp.lt.s32.totalorder %s1286_s17, 3 }
   0xf   : > { %s1381_s26 = scalar_select %p38_p7, %s1274_s14, %s40_s21  }
  0x10   : > { %p1383_p11 = por %p137_p10, %p53_p3  ;;  %s157_s28 = sand.u32 1, %s1274_s14  }
  0x11   : > { %s1001_s29 = sshll.u32 %s157_s28, 5  ;;  %s1068_s30 = sshll.u32 %s1282_s16, 8 }
  0x12   : > { %s170_s6 = scalar_lea.hbm %s1571_s0, %s1068_s30  ;;  %s161_s7 = scalar_lea.vmem [#allocation3], %s1001_s29 }
  0x13   : > { %s171_s8 = sshll.u32 %s161_s7, 4  ;;  %p1395_p13 = pnand %p1083_p12, %p1366_p4  ;;  %s172_s8 = int_to_ptr.vmem [resolvable:$true] %s171_s8 }
  0x14   : > { %s158_s10 = scalar_lea.sflag [#allocation4], %s157_s28  ;;  %s1191_s11 = scalar_lea.vmem %s172_s8, 512 }
  0x15   : > { %p1180_p0 = pneg %p1395_p13  ;;  %p1192_p1 = scmp.ne.s32.totalorder %s172_s8, %s1191_s11 }
  0x16   : > { %s1288_s18 = smov [#allocation3]  }
  0x17   : > { %p1194_p2 = pnand %p1192_p1, %p1180_p0  ;;  %s1196_s19 = sshll.u32 %s1288_s18, 4  ;;  %s1197_s19 = int_to_ptr.vmem [resolvable:$false] %s1196_s19 }
  0x18   : > { %s1198_s21 = scalar_lea.vmem %s1197_s19, 1024  ;;  %p1199_p5 = scmp.lt.s32.totalorder %s172_s8, %s1197_s19 }
  0x19   : > { %p1195_p3 = pneg %p1194_p2  ;;  %p1200_p6 = scmp.lt.s32.totalorder %s1198_s21, %s1191_s11 }
  0x1b   : > { %p1201_p7 = por %p1200_p6, %p1199_p5 }
  0x1d   : > { %p1202_p10 = pnand %p1201_p7, %p1195_p3 }
  0x1f   : > { %1205 = shalt.err (!%p1202_p10)
}
  0x20   : > { %s1289_s22 = smov 768   ;;  %s1290_s23 = smov 256  }
  0x21   : > { %s1291_s28 = smov 16   ;;  %p1004_p4 = scmp.ge.s32.totalorder %s1286_s17, 1 }
  0x22   : > { %1078 = dma.hbm_to_vmem [thread:$0]  (!%p1395_p13), %s170_s6, 512, %s172_s8, %s158_s10, %s1289_s22, %s1290_s23, %s1291_s28  }
  0x23   : > { %p193_p12 = scmp.lt.s32.totalorder %s1286_s17, 4 }
  0x25   : > { %p194_p0 = pnand %p1004_p4, %p193_p12 }
  0x26   : > { %s1406_s29 = sand.u32 (!%p194_p0), 1, %s1270_s13  }
  0x27   : > { %197 = sbr.rel (%p194_p0) target bundleno = 450 (0x1c2), region = 32  ;;  %s1005_s30 = sshll.u32 (!%p194_p0), %s1406_s29, 5 }
  0x28   : > { %s200_s4 = scalar_lea.sflag (!%p194_p0), [#allocation4], %s1406_s29  ;;  %s1410_s5 = scalar_lea.vmem (!%p194_p0), [#allocation3], %s1005_s30 }
  0x2c   : > { %1257 = dma.done.wait (%p1372_p8), %s200_s4, 512  }
  0x2d   : > { %1259 = vsyncadd (%p1372_p8), %s200_s4, 4294966784  ;;  %v1417_v0 = vld [vmem:[%s1410_s5] sm:$0xff]  ;;  %s1292_s6 = smov 90   ;;  %s1293_s7 = smov 92   ;;  %v1024_v1 = vld [vmem:[%s1410_s5 + $0x10] sm:$0xff]  ;;  %v1300_v4 = vmov 0  }
  0x2e   : > { %380 = vrot.lane.b32.xlu0 %v1417_v0, %s1292_s6  ;;  %344 = vrot.lane.b32.xlu1 %v1417_v0, %s1293_s7  ;;  %v377_v2 = vld [vmem:[%s1410_s5 + $0x8] sm:$0xff]  ;;  %397 = vst [vmem:[#allocation2 + $0xc] sm:$0xff] %v1024_v1  ;;  %s1294_s24 = smov 91   ;;  %s1295_s8 = smov 109   ;;  %v1025_v3 = vld [vmem:[%s1410_s5 + $0x18] sm:$0xff]  ;;  %vm259_vm0 = vcmask 1043456  }
  0x2f   : > { %s1296_s9 = smov 108   ;;  %s1297_s10 = smov 126   ;;  %753 = vmatprep.mubr.bf16.mxu0 %v1300_v4  ;;  %794 = vmatprep.mubr.bf16.mxu1 %v1300_v4  ;;  %v246_v5 = vld [vmem:[%s1410_s5 + $0x8] sm:$0xf]  ;;  %v1009_v6 = vld [vmem:[%s1410_s5 + $0x18] sm:$0xf] }
  0x30   : > { %s1298_s11 = smov 110   ;;  %s1299_s18 = smov 127   ;;  %1148 = vset.pattern.permute.xlu0 %v1300_v4  ;;  %1149 = vset.pattern.permute.xlu1 %v1300_v4  ;;  %248 = vst [vmem:[#allocation2 + $0x8] sm:$0xf] %v246_v5  ;;  %398 = vst [vmem:[#allocation2 + $0x14] sm:$0xf] %v1009_v6 }
  0x31   : > { %p235_p8 = scmp.lt.s32.totalorder %s1278_s15, 2  ;;  %vm387_vm1 = vcmask 736256   ;;  %vm351_vm2 = vcmask 752640   ;;  %vm369_vm3 = vcmask 744448   ;;  %vm315_vm4 = vcmask 891904  }
  0x32   : > { %382 = vrot.lane.b32.xlu0 %v377_v2, %s1292_s6  ;;  %346 = vrot.lane.b32.xlu1 %v377_v2, %s1293_s7  ;;  %vm333_vm5 = vcmask 883712   ;;  %vm279_vm6 = vcmask 1031168   ;;  %vm297_vm7 = vcmask 900096   ;;  %vm261_vm8 = vcmask 1039360  }
  0x33   : > { %s1442_s19 = scalar_select %p235_p8, %s1278_s15, 2  ;;  %vm698_vm9 = vcmask 588800  }
  0x35   : > { %s1007_s21 = sshll.u32 %s1442_s19, 3  ;;  %s1006_s30 = sshll.u32 %s1442_s19, 2 }
  0x36   : > { %362 = vrot.lane.b32.xlu0 %v1417_v0, %s1294_s24  ;;  %364 = vrot.lane.b32.xlu1 %v377_v2, %s1294_s24  ;;  %s242_s28 = scalar_lea.vmem %s1573_s2, %s1007_s21  ;;  %s1301_s21 = smov [#allocation6]  }
  0x37   : > { %v844_v7 = vld [vmem:[%s242_s28] sm:$0xff]  ;;  %s1210_s22 = sshll.u32 %s1301_s21, 4  ;;  %s1211_s22 = int_to_ptr.vmem [resolvable:$false] %s1210_s22 }
  0x38   : > { %s1212_s23 = scalar_lea.vmem %s1211_s22, 1536 }
  0x3a   : > { %310 = vrot.lane.b32.xlu1 %v377_v2, %s1295_s8  ;;  %308 = vrot.lane.b32.xlu0 %v1417_v0, %s1295_s8 }
  0x3e   : > { %328 = vrot.lane.b32.xlu1 %v377_v2, %s1296_s9  ;;  %326 = vrot.lane.b32.xlu0 %v1417_v0, %s1296_s9 }
  0x42   : > { %274 = vrot.lane.b32.xlu1 %v377_v2, %s1297_s10  ;;  %272 = vrot.lane.b32.xlu0 %v1417_v0, %s1297_s10 }
  0x46   : > { %292 = vrot.lane.b32.xlu1 %v377_v2, %s1298_s11  ;;  %290 = vrot.lane.b32.xlu0 %v1417_v0, %s1298_s11 }
  0x4a   : > { %255 = vrot.lane.b32.xlu1 %v377_v2, %s1299_s18  ;;  %253 = vrot.lane.b32.xlu0 %v1417_v0, %s1299_s18 }
  0x4e   : > { %524 = vrot.lane.b32.xlu1 %v1025_v3, %s1292_s6  ;;  %522 = vrot.lane.b32.xlu0 %v1024_v1, %s1292_s6  ;;  %s238_s6 = scalar_lea.vmem %s1572_s1, %s1006_s30 }
  0x52   : > { %490 = vrot.lane.b32.xlu1 %v1025_v3, %s1293_s7  ;;  %488 = vrot.lane.b32.xlu0 %v1024_v1, %s1293_s7  ;;  %s1069_s7 = smul.u32 48, %s1406_s29 }
  0x56   : > { %507 = vrot.lane.b32.xlu1 %v1025_v3, %s1294_s24  ;;  %505 = vrot.lane.b32.xlu0 %v1024_v1, %s1294_s24  ;;  %s233_s24 = scalar_lea.vmem [#allocation6], %s1069_s7 }
  0x5a   : > { %456 = vrot.lane.b32.xlu1 %v1025_v3, %s1295_s8  ;;  %454 = vrot.lane.b32.xlu0 %v1024_v1, %s1295_s8  ;;  %s886_s8 = sshll.u32 %s233_s24, 4  ;;  %s1519_s8 = int_to_ptr.vmem [resolvable:$true] %s886_s8 }
  0x5b   : > { %s1206_s19 = scalar_lea.vmem %s1519_s8, 768  ;;  %p1213_p3 = scmp.lt.s32.totalorder %s1519_s8, %s1211_s22 }
  0x5c   : > { %p1207_p13 = scmp.ne.s32.totalorder %s1519_s8, %s1206_s19  ;;  %p1214_p5 = scmp.lt.s32.totalorder %s1212_s23, %s1206_s19 }
  0x5e   : > { %473 = vrot.lane.b32.xlu1 %v1025_v3, %s1296_s9  ;;  %471 = vrot.lane.b32.xlu0 %v1024_v1, %s1296_s9  ;;  %s1070_s9 = smul.u32 384, %s1278_s15  ;;  %s870_s15 = scalar_lea.sflag [#allocation5], %s1406_s29 }
  0x5f   : > { %p1208_p1 = pnand %p1207_p13, %p1376_p9  ;;  %p1215_p6 = por %p1214_p5, %p1213_p3 }
  0x61   : > { %p1209_p2 = pneg %p1208_p1 }
  0x62   : > { %422 = vrot.lane.b32.xlu1 %v1025_v3, %s1297_s10  ;;  %420 = vrot.lane.b32.xlu0 %v1024_v1, %s1297_s10 }
  0x63   : > { %p1216_p7 = pnand %p1215_p6, %p1209_p2 }
  0x66   : > { %439 = vrot.lane.b32.xlu1 %v1025_v3, %s1298_s11  ;;  %437 = vrot.lane.b32.xlu0 %v1024_v1, %s1298_s11 }
  0x6a   : > { %405 = vrot.lane.b32.xlu1 %v1025_v3, %s1299_s18  ;;  %403 = vrot.lane.b32.xlu0 %v1024_v1, %s1299_s18  ;;  %s1524_s18 = scalar_lea.hbm %s1574_s3, %s1070_s9 }
  0x6e   : > { %847 = vperm.xlu0 %1148, %v844_v7   ;;  %859 = vperm.xlu1 %1149, %v844_v7  }
  0xa0   : > { %v381_v8 = vpop.permute.xlu0 %380  ;;  %v345_v9 = vpop.permute.xlu1 %344 }
  0xa1   : > { %v384_v12 = vrot.slane %v381_v8, 4  ;;  %v348_v13 = vrot.slane %v345_v9, 4 }
  0xa4   : > { %v383_v10 = vpop.permute.xlu0 %382  ;;  %v347_v11 = vpop.permute.xlu1 %346 }
  0xa5   : > { %v385_v14 = vrot.slane %v383_v10, 4  ;;  %v349_v15 = vrot.slane %v347_v11, 4 }
  0xa7   : > { %v386_v16 = vsel %vm259_vm0, %v384_v12, %v385_v14  ;;  %v389_v17 = vsel %vm387_vm1, %v383_v10, %v385_v14  ;;  %v350_v18 = vsel %vm259_vm0, %v348_v13, %v349_v15  ;;  %v353_v19 = vsel %vm351_vm2, %v347_v11, %v349_v15 }
  0xa8   : > { %v388_v20 = vsel %vm387_vm1, %v381_v8, %v386_v16  ;;  %393 = vst [vmem:[#allocation2 + $0xc8] sm:$0xf] %v389_v17  ;;  %v352_v21 = vsel %vm351_vm2, %v345_v9, %v350_v18  ;;  %357 = vst [vmem:[#allocation2 + $0x98] sm:$0xf] %v353_v19  ;;  %v363_v22 = vpop.permute.xlu0 %362  ;;  %v365_v23 = vpop.permute.xlu1 %364 }
  0xa9   : > { %v366_v24 = vrot.slane %v363_v22, 4  ;;  %v367_v25 = vrot.slane %v365_v23, 4  ;;  %v1051_v26 = vcombine.high %v388_v20, %v388_v20  ;;  %v1050_v27 = vcombine.low %v388_v20, %v388_v20 }
  0xab   : > { %v368_v28 = vsel %vm259_vm0, %v366_v24, %v367_v25  ;;  %v371_v29 = vsel %vm369_vm3, %v365_v23, %v367_v25  ;;  %1056 = vmatprep.subr.msk.bf16.mxu0 %vm259_vm0, %v1051_v26  ;;  %v704_v30 = vsel %vm259_vm0, %v1050_v27, 0 }
  0xac   : > { %v370_v31 = vsel %vm369_vm3, %v363_v22, %v368_v28  ;;  %375 = vst [vmem:[#allocation2 + $0xb0] sm:$0xf] %v371_v29  ;;  %v311_v32 = vpop.permute.xlu1 %310  ;;  %v309_v33 = vpop.permute.xlu0 %308  ;;  %728 = vmatpush1.bf16.msra.mxu0 %v704_v30  ;;  %v1483_v22 = vld [vmem:[%s238_s6] sm:$0xf] }
  0xad   : > { %v313_v34 = vrot.slane %v311_v32, 4  ;;  %v312_v35 = vrot.slane %v309_v33, 4  ;;  %v1045_v36 = vcombine.high %v352_v21, %v370_v31  ;;  %v1044_v37 = vcombine.low %v352_v21, %v370_v31 }
  0xaf   : > { %v317_v38 = vsel %vm315_vm4, %v311_v32, %v313_v34  ;;  %v314_v39 = vsel %vm259_vm0, %v312_v35, %v313_v34  ;;  %729 = vmatprep.subr.bf16.mxu0 %v1045_v36 }
  0xb0   : > { %321 = vst [vmem:[#allocation2 + $0x68] sm:$0xf] %v317_v38  ;;  %v316_v40 = vsel %vm315_vm4, %v309_v33, %v314_v39  ;;  %v329_v41 = vpop.permute.xlu1 %328  ;;  %v327_v42 = vpop.permute.xlu0 %326  ;;  %730 = vmatpush1.bf16.msra.mxu0 %v1044_v37 }
  0xb1   : > { %v331_v43 = vrot.slane %v329_v41, 4  ;;  %v330_v44 = vrot.slane %v327_v42, 4 }
  0xb3   : > { %v335_v45 = vsel %vm333_vm5, %v329_v41, %v331_v43  ;;  %v332_v46 = vsel %vm259_vm0, %v330_v44, %v331_v43 }
  0xb4   : > { %339 = vst [vmem:[#allocation2 + $0x80] sm:$0xf] %v335_v45  ;;  %v334_v47 = vsel %vm333_vm5, %v327_v42, %v332_v46  ;;  %v275_v48 = vpop.permute.xlu1 %274  ;;  %v273_v49 = vpop.permute.xlu0 %272 }
  0xb5   : > { %v277_v50 = vrot.slane %v275_v48, 4  ;;  %v276_v51 = vrot.slane %v273_v49, 4  ;;  %v1039_v52 = vcombine.high %v316_v40, %v334_v47  ;;  %v1038_v53 = vcombine.low %v316_v40, %v334_v47 }
  0xb7   : > { %v281_v54 = vsel %vm279_vm6, %v275_v48, %v277_v50  ;;  %v278_v55 = vsel %vm259_vm0, %v276_v51, %v277_v50  ;;  %731 = vmatprep.subr.bf16.mxu0 %v1039_v52 }
  0xb8   : > { %285 = vst [vmem:[#allocation2 + $0x38] sm:$0xf] %v281_v54  ;;  %v280_v56 = vsel %vm279_vm6, %v273_v49, %v278_v55  ;;  %v293_v57 = vpop.permute.xlu1 %292  ;;  %v291_v58 = vpop.permute.xlu0 %290  ;;  %732 = vmatpush1.bf16.msra.mxu0 %v1038_v53 }
  0xb9   : > { %v295_v59 = vrot.slane %v293_v57, 4  ;;  %v294_v60 = vrot.slane %v291_v58, 4 }
  0xbb   : > { %v299_v61 = vsel %vm297_vm7, %v293_v57, %v295_v59  ;;  %v296_v62 = vsel %vm259_vm0, %v294_v60, %v295_v59 }
  0xbc   : > { %303 = vst [vmem:[#allocation2 + $0x50] sm:$0xf] %v299_v61  ;;  %v298_v63 = vsel %vm297_vm7, %v291_v58, %v296_v62  ;;  %v256_v1 = vpop.permute.xlu1 %255  ;;  %v254_v2 = vpop.permute.xlu0 %253  ;;  %v1159_v62 = vld [vmem:[#allocation2 + $0x98] ss:$24 sps:$4 sm:$0xff]  }
  0xbd   : > { %v258_v3 = vrot.slane %v256_v1, 4  ;;  %v257_v5 = vrot.slane %v254_v2, 4  ;;  %v1033_v6 = vcombine.high %v280_v56, %v298_v63  ;;  %v1032_v7 = vcombine.low %v280_v56, %v298_v63 }
  0xbf   : > { %v263_v8 = vsel %vm261_vm8, %v256_v1, %v258_v3  ;;  %v260_v9 = vsel %vm259_vm0, %v257_v5, %v258_v3  ;;  %733 = vmatprep.subr.bf16.mxu0 %v1033_v6 }
  0xc0   : > { %267 = vst [vmem:[#allocation2 + $0x20] sm:$0xf] %v263_v8  ;;  %v262_v10 = vsel %vm261_vm8, %v254_v2, %v260_v9  ;;  %v525_v11 = vpop.permute.xlu1 %524  ;;  %v523_v12 = vpop.permute.xlu0 %522  ;;  %734 = vmatpush1.bf16.msra.mxu0 %v1032_v7 }
  0xc1   : > { %v527_v13 = vrot.slane %v525_v11, 4  ;;  %v526_v14 = vrot.slane %v523_v12, 4  ;;  %v1027_v15 = vcombine.high %v1417_v0, %v262_v10  ;;  %v1026_v16 = vcombine.low %v1417_v0, %v262_v10 }
  0xc3   : > { %v530_v17 = vsel %vm387_vm1, %v525_v11, %v527_v13  ;;  %v528_v18 = vsel %vm259_vm0, %v526_v14, %v527_v13  ;;  %735 = vmatprep.subr.bf16.mxu0 %v1027_v15 }
  0xc4   : > { %534 = vst [vmem:[#allocation2 + $0xd4] sm:$0xf] %v530_v17  ;;  %v529_v19 = vsel %vm387_vm1, %v523_v12, %v528_v18  ;;  %v491_v20 = vpop.permute.xlu1 %490  ;;  %v489_v21 = vpop.permute.xlu0 %488  ;;  %736 = vmatpush1.bf16.msra.mxu0 %v1026_v16  ;;  %v1165_v18 = vld [vmem:[#allocation2 + $0x68] ss:$24 sps:$4 sm:$0xff]  }
  0xc5   : > { %533 = vst [vmem:[#allocation2 + $0xcc] sm:$0xff] %v529_v19  ;;  %v493_v0 = vrot.slane %v491_v20, 4  ;;  %v492_v23 = vrot.slane %v489_v21, 4 }
  0xc7   : > { %v496_v24 = vsel %vm351_vm2, %v491_v20, %v493_v0  ;;  %v494_v25 = vsel %vm259_vm0, %v492_v23, %v493_v0  ;;  %1057 = vmatmul.mubr.msk.bf16.vlgmr.msra.gmra.mxu0 %vm698_vm9, %v1483_v22 }
  0xc8   : > { %500 = vst [vmem:[#allocation2 + $0xa4] sm:$0xf] %v496_v24  ;;  %v495_v26 = vsel %vm351_vm2, %v489_v21, %v494_v25  ;;  %v508_v27 = vpop.permute.xlu1 %507  ;;  %v506_v28 = vpop.permute.xlu0 %505  ;;  %835 = vmatprep.mubr.bf16.mxu0 %v1300_v4  ;;  %v1171_v25 = vld [vmem:[#allocation2 + $0x38] ss:$24 sps:$4 sm:$0xff]  }
  0xc9   : > { %499 = vst [vmem:[#allocation2 + $0x9c] sm:$0xff] %v495_v26  ;;  %v510_v29 = vrot.slane %v508_v27, 4  ;;  %v509_v30 = vrot.slane %v506_v28, 4 }
  0xcb   : > { %v513_v31 = vsel %vm369_vm3, %v508_v27, %v510_v29  ;;  %v511_v32 = vsel %vm259_vm0, %v509_v30, %v510_v29  ;;  %v1177_v29 = vld [vmem:[#allocation2 + $0x8] ss:$24 sps:$4 sm:$0xff]  }
  0xcc   : > { %517 = vst [vmem:[#allocation2 + $0xbc] sm:$0xf] %v513_v31  ;;  %v512_v33 = vsel %vm369_vm3, %v506_v28, %v511_v32  ;;  %v457_v34 = vpop.permute.xlu1 %456  ;;  %v455_v35 = vpop.permute.xlu0 %454  ;;  %v561_v36 = vld [vmem:[#allocation2 + $0xc8] sm:$0xff]  ;;  %v562_v37 = vld [vmem:[#allocation2 + $0xd0] sm:$0xff] }
  0xcd   : > { %516 = vst [vmem:[#allocation2 + $0xb4] sm:$0xff] %v512_v33  ;;  %v459_v38 = vrot.slane %v457_v34, 4  ;;  %v458_v39 = vrot.slane %v455_v35, 4  ;;  %v1053_v40 = vcombine.high %v561_v36, %v561_v36  ;;  %v1055_v41 = vcombine.high %v562_v37, %v562_v37 }
  0xce   : > { %v1052_v4 = vcombine.low %v561_v36, %v561_v36  ;;  %v1054_v42 = vcombine.low %v562_v37, %v562_v37 }
  0xcf   : > { %v462_v43 = vsel %vm315_vm4, %v457_v34, %v459_v38  ;;  %v460_v44 = vsel %vm259_vm0, %v458_v39, %v459_v38  ;;  %1058 = vmatprep.subr.msk.bf16.mxu1 %vm259_vm0, %v1053_v40  ;;  %1060 = vmatprep.subr.msk.bf16.mxu0 %vm259_vm0, %v1055_v41 }
  0xd0   : > { %466 = vst [vmem:[#allocation2 + $0x74] sm:$0xf] %v462_v43  ;;  %v461_v45 = vsel %vm315_vm4, %v455_v35, %v460_v44  ;;  %v474_v46 = vpop.permute.xlu1 %473  ;;  %v710_v47 = vsel %vm259_vm0, %v1052_v4, 0  ;;  %v472_v48 = vpop.permute.xlu0 %471  ;;  %v716_v49 = vsel %vm259_vm0, %v1054_v42, 0 }
  0xd1   : > { %465 = vst [vmem:[#allocation2 + $0x6c] sm:$0xff] %v461_v45  ;;  %v476_v50 = vrot.slane %v474_v46, 4  ;;  %769 = vmatpush1.bf16.msra.mxu1 %v710_v47  ;;  %v475_v51 = vrot.slane %v472_v48, 4  ;;  %810 = vmatpush1.bf16.msra.mxu0 %v716_v49 }
  0xd3   : > { %v479_v52 = vsel %vm333_vm5, %v474_v46, %v476_v50  ;;  %v477_v53 = vsel %vm259_vm0, %v475_v51, %v476_v50  ;;  %v1158_v61 = vld [vmem:[#allocation2 + $0xa4] ss:$24 sps:$4 sm:$0xff]  }
  0xd4   : > { %483 = vst [vmem:[#allocation2 + $0x8c] sm:$0xf] %v479_v52  ;;  %v478_v54 = vsel %vm333_vm5, %v472_v48, %v477_v53  ;;  %v423_v55 = vpop.permute.xlu1 %422  ;;  %v421_v56 = vpop.permute.xlu0 %420  ;;  %v1154_v57 = vld [vmem:[#allocation2 + $0x9c] ss:$24 sps:$4 sm:$0xff]   ;;  %v1156_v60 = vld [vmem:[#allocation2 + $0xa0] ss:$24 sps:$4 sm:$0xff]   ;;  %811 = vmatprep.subr.bf16.mxu0 %v1158_v61 }
  0xd5   : > { %482 = vst [vmem:[#allocation2 + $0x84] sm:$0xff] %v478_v54  ;;  %v425_v58 = vrot.slane %v423_v55, 4  ;;  %v424_v59 = vrot.slane %v421_v56, 4  ;;  %770 = vmatprep.subr.bf16.mxu1 %v1154_v57  ;;  %812 = vmatpush1.bf16.msra.mxu0 %v1156_v60 }
  0xd6   : > { %771 = vmatpush1.bf16.msra.mxu1 %v1159_v62 }
  0xd7   : > { %v428_v63 = vsel %vm279_vm6, %v423_v55, %v425_v58  ;;  %v426_v1 = vsel %vm259_vm0, %v424_v59, %v425_v58 }
  0xd8   : > { %432 = vst [vmem:[#allocation2 + $0x44] sm:$0xf] %v428_v63  ;;  %v427_v2 = vsel %vm279_vm6, %v421_v56, %v426_v1  ;;  %v440_v3 = vpop.permute.xlu1 %439  ;;  %v438_v5 = vpop.permute.xlu0 %437 }
  0xd9   : > { %431 = vst [vmem:[#allocation2 + $0x3c] sm:$0xff] %v427_v2  ;;  %v442_v6 = vrot.slane %v440_v3, 4  ;;  %v441_v7 = vrot.slane %v438_v5, 4 }
  0xdb   : > { %v445_v8 = vsel %vm297_vm7, %v440_v3, %v442_v6  ;;  %v443_v9 = vsel %vm259_vm0, %v441_v7, %v442_v6  ;;  %v1164_v17 = vld [vmem:[#allocation2 + $0x74] ss:$24 sps:$4 sm:$0xff]  }
  0xdc   : > { %449 = vst [vmem:[#allocation2 + $0x5c] sm:$0xf] %v445_v8  ;;  %v444_v10 = vsel %vm297_vm7, %v438_v5, %v443_v9  ;;  %v406_v11 = vpop.permute.xlu1 %405  ;;  %v404_v12 = vpop.permute.xlu0 %403  ;;  %v1160_v13 = vld [vmem:[#allocation2 + $0x6c] ss:$24 sps:$4 sm:$0xff]   ;;  %v1162_v16 = vld [vmem:[#allocation2 + $0x70] ss:$24 sps:$4 sm:$0xff]   ;;  %813 = vmatprep.subr.bf16.mxu0 %v1164_v17 }
  0xdd   : > { %448 = vst [vmem:[#allocation2 + $0x54] sm:$0xff] %v444_v10  ;;  %v408_v14 = vrot.slane %v406_v11, 4  ;;  %v407_v15 = vrot.slane %v404_v12, 4  ;;  %772 = vmatprep.subr.bf16.mxu1 %v1160_v13  ;;  %814 = vmatpush1.bf16.msra.mxu0 %v1162_v16 }
  0xde   : > { %773 = vmatpush1.bf16.msra.mxu1 %v1165_v18 }
  0xdf   : > { %v411_v19 = vsel %vm261_vm8, %v406_v11, %v408_v14  ;;  %v409_v20 = vsel %vm259_vm0, %v407_v15, %v408_v14 }
  0xe0   : > { %415 = vst [vmem:[#allocation2 + $0x2c] sm:$0xf] %v411_v19  ;;  %v410_v21 = vsel %vm261_vm8, %v404_v12, %v409_v20 }
  0xe1   : > { %414 = vst [vmem:[#allocation2 + $0x24] sm:$0xff] %v410_v21 }
  0xe3   : > { %v1170_v24 = vld [vmem:[#allocation2 + $0x44] ss:$24 sps:$4 sm:$0xff]  }
  0xe4   : > { %v1166_v0 = vld [vmem:[#allocation2 + $0x3c] ss:$24 sps:$4 sm:$0xff]   ;;  %v1168_v23 = vld [vmem:[#allocation2 + $0x40] ss:$24 sps:$4 sm:$0xff]   ;;  %815 = vmatprep.subr.bf16.mxu0 %v1170_v24 }
  0xe5   : > { %774 = vmatprep.subr.bf16.mxu1 %v1166_v0  ;;  %816 = vmatpush1.bf16.msra.mxu0 %v1168_v23 }
  0xe6   : > { %775 = vmatpush1.bf16.msra.mxu1 %v1171_v25 }
  0xe7   : > { %v1176_v28 = vld [vmem:[#allocation2 + $0x14] ss:$24 sps:$4 sm:$0xff]  }
  0xe8   : > { %v1172_v26 = vld [vmem:[#allocation2 + $0xc] ss:$24 sps:$4 sm:$0xff]   ;;  %v1174_v27 = vld [vmem:[#allocation2 + $0x10] ss:$24 sps:$4 sm:$0xff]   ;;  %817 = vmatprep.subr.bf16.mxu0 %v1176_v28 }
  0xe9   : > { %776 = vmatprep.subr.bf16.mxu1 %v1172_v26  ;;  %818 = vmatpush1.bf16.msra.mxu0 %v1174_v27  ;;  %v848_v30 = vpop.permute.xlu0 %847  ;;  %v860_v37 = vpop.permute.xlu1 %859 }
  0xea   : > { %777 = vmatpush1.bf16.msra.mxu1 %v1177_v29 }
  0xec   : > { %1061 = vmatmul.mubr.msk.bf16.vlgmr.msra.gmra.mxu0 %vm698_vm9, %v1483_v22 }
  0xed   : > { %1059 = vmatmul.mubr.msk.bf16.vlgmr.msra.gmra.mxu1 %vm698_vm9, %v1483_v22 }
 0x187   : > { %v755_v31 = vpop.f32.mrf.mxu0 }
 0x188   : > { %v850_v32 = vadd.f32 %v848_v30, %v755_v31 }
 0x189   : > { %v757_v33 = vpop.f32.mrf.mxu0 }
 0x18a   : > { %v851_v34 = vadd.f32 %v848_v30, %v757_v33  ;;  %853 = vst [vmem:[%s233_s24] sm:$0xff] %v850_v32 }
 0x18b   : > { %v759_v35 = vpop.f32.mrf.mxu0 }
 0x18c   : > { %854 = vst [vmem:[%s233_s24 + $0x8] sm:$0xff] %v851_v34 }
 0x18d   : > { %v760_v36 = vpop.f32.mrf.mxu0 }
 0x1ac   : > { %v837_v40 = vpop.f32.mrf.mxu0 }
 0x1ad   : > { %v796_v38 = vpop.f32.mrf.mxu1  ;;  %v863_v22 = vadd.f32 %v860_v37, %v837_v40 }
 0x1ae   : > { %v852_v39 = vadd.f32 %v848_v30, %v796_v38  ;;  %v839_v42 = vpop.f32.mrf.mxu0 }
 0x1af   : > { %v798_v41 = vpop.f32.mrf.mxu1  ;;  %1063 = vst [vmem:[%s233_s24 + $0x20] sm:$0xff] %v863_v22  ;;  %v864_v43 = vadd.f32 %v860_v37, %v839_v42 }
 0x1b0   : > { %855 = vst [vmem:[%s233_s24 + $0x10] sm:$0xff] %v852_v39  ;;  %v862_v4 = vadd.f32 %v860_v37, %v798_v41  ;;  %v841_v45 = vpop.f32.mrf.mxu0 }
 0x1b1   : > { %v800_v44 = vpop.f32.mrf.mxu1  ;;  %1064 = vst [vmem:[%s233_s24 + $0x28] sm:$0xff] %v864_v43 }
 0x1b2   : > { %1062 = vst [vmem:[%s233_s24 + $0x18] sm:$0xff] %v862_v4  ;;  %v842_v47 = vpop.f32.mrf.mxu0 }
 0x1b3   : > { %v801_v46 = vpop.f32.mrf.mxu1 }
 0x1b4   : > { %1219 = shalt.err (!%p1216_p7)
}
 0x1b5   : > { %s1220_s28 = scalar_lea.hbm %s1524_s18, 768  ;;  %s1224_s5 = scalar_lea.hbm %s1574_s3, 2304 }
 0x1b6   : > { %p1221_p10 = scmp.ne.s32.totalorder %s1524_s18, %s1220_s28  ;;  %p1225_p0 = scmp.lt.s32.totalorder %s1524_s18, %s1574_s3 }
 0x1b7   : > { %p1226_p8 = scmp.lt.s32.totalorder %s1224_s5, %s1220_s28 }
 0x1b8   : > { %p1222_p4 = pnand %p1221_p10, %p1376_p9 }
 0x1b9   : > { %p1227_p13 = por %p1226_p8, %p1225_p0 }
 0x1ba   : > { %p1223_p12 = pneg %p1222_p4 }
 0x1bc   : > { %p1228_p1 = pnand %p1227_p13, %p1223_p12 }
 0x1be   : > { %1231 = shalt.err (!%p1228_p1)
}
 0x1bf   : > { %s1302_s24 = smov 384   ;;  %s1303_s9 = smov 1152  }
 0x1c0   : > { %s1304_s10 = smov 24  }
 0x1c1   : > { %1073 = dma.vmem_to_hbm [thread:$0]  (%p1376_p9), %s1519_s8, 768, %s1524_s18, %s870_s15, %s1302_s24, %s1303_s9, %s1304_s10  }
 0x1c2 PF: > { %p1084_p2 = scmp.ge.s32.totalorder %s1286_s17, 2  ;;  %s901_s11 = sand.u32 1, %s1266_s12  }
 0x1c3   : > { %s902_s19 = scalar_lea.sflag [#allocation5], %s901_s11 }
 0x1c4   : > { %p1080_p3 = pnand %p1084_p2, %p1383_p11 }
 0x1c6   : > { %p1081_p5 = pneg %p1080_p3 }
 0x1c8   : > { %1261 = dma.done.wait (%p1081_p5), %s902_s19, 768  }
 0x1c9   : > { %1263 = vsyncadd (%p1081_p5), %s902_s19, 4294966528  ;;  %s19_s17 = sadd.s32 1, %s1286_s17   ;;  %s1580_s12 = smov %s1270_s13 }
 0x1ca   : > { %p16_p6 = scmp.ge.s32.totalorder %s19_s17, 5   ;;  %s1581_s13 = smov %s1274_s14 }
 0x1cb   : > { %s1582_s14 = smov %s1381_s26  ;;  %s1583_s15 = smov %s1282_s16 }
 0x1cc   : > { %s1584_s16 = smov %s1586_s20  ;;  %18 = sbr.rel (!%p16_p6) target bundleno = 6 (0x6), region = 85 }
 0x1d1   :  { %907 = vsyncpa [#allocation4], 1 }
 0x1d2   :  { %909 = vsyncpa [#allocation4 + $0x1], 1 }
 0x1d3   :  { %910 = vsyncpa [#allocation5], 1 }
 0x1d4   :  { %912 = vsyncpa [#allocation5 + $0x1], 1 }

</bundles_post_ra>
